<compile_context>
chip_gen: v6e
topology: v6e:2x2x1
jax: 0.10.0
libtpu: 0.0.40
codegen_flags: <defaults>
</compile_context>

<pallas_src>
import functools

import jax
import jax.numpy as jnp
from jax.experimental import pallas as pl
from jax.experimental.pallas import tpu as pltpu


# ---------------------------------------------------------------------------
# Kernel
# ---------------------------------------------------------------------------
def _policy_ensemble_kernel(x_ref, w0_ref, b0_ref, w1_ref, b1_ref,
                            w2_ref, b2_ref, w3_ref, b3_ref, out_ref,
                            *, sigmoid_start):
    """4-matmul fused forward.  sigmoid_start = 5 * output_size (static)."""
    cdt = w0_ref.dtype  # compute dtype for MXU operands (bf16 or f32)

    def linear(v, w_ref, b_ref):
        # bf16 (or f32) MXU operands, f32 accumulation, f32 bias add.
        return (jnp.dot(v.astype(cdt), w_ref[...],
                        preferred_element_type=jnp.float32)
                + b_ref[...])

    def relu(v):
        return jnp.maximum(v, 0.0)

    x = x_ref[...]

    l0 = relu(linear(x, w0_ref, b0_ref))     # (B, 16)    shared trunk fc0
    h1 = relu(linear(l0, w1_ref, b1_ref))    # (B, 560)   all fc1_* fused
    h2 = relu(linear(h1, w2_ref, b2_ref))    # (B, 280)   all fc2_* (block-diag)
    o = linear(h2, w3_ref, b3_ref)           # (B, 5*out+1) all fc3_* (block-diag)

    # Sigmoid only on the aux-head columns (the last column(s) of the slab).
    sig = pl.reciprocal(1.0 + jnp.exp(-o), approx=False)
    col = jax.lax.broadcasted_iota(jnp.int32, o.shape, 1)
    o = jnp.where(col >= sigmoid_start, sig, o)

    out_ref[...] = o.astype(out_ref.dtype)   # single lane-contiguous store


# ---------------------------------------------------------------------------
# Host-side parameter packing (done once, outside the per-call path)
# ---------------------------------------------------------------------------
# `params` is a list of 19 (W, b) tuples with W shaped (in, out) and b shaped
# (1, out), in this order:
#   0            : fc0
#   1,  2,  3    : head0 (fc1_0, fc2_0, fc3_0)
#   4,  5,  6    : head1 (fc1_1, fc2_1, fc3_1)
#   7,  8,  9    : head2 (fc1_2, fc2_2, fc3_2)
#  10, 11, 12    : head3 (fc1_3, fc2_3, fc3_3)
#  13, 14, 15    : head4 (fc1_4, fc2_4, fc3_4)
#  16, 17, 18    : aux head (fc1_a, fc2_a, fc3_a)
_HEAD_FIRST = (1, 4, 7, 10, 13, 16)


def pack_params(params, compute_dtype=jnp.bfloat16):
    """Fold the 19 layers into 4 (W, b) pairs; weights cast to compute_dtype."""
    w0, b0 = params[0]

    w1 = jnp.concatenate([params[i][0] for i in _HEAD_FIRST], axis=1)
    b1 = jnp.concatenate([params[i][1] for i in _HEAD_FIRST], axis=1)

    w2 = jax.scipy.linalg.block_diag(*[params[i + 1][0] for i in _HEAD_FIRST])
    b2 = jnp.concatenate([params[i + 1][1] for i in _HEAD_FIRST], axis=1)

    w3 = jax.scipy.linalg.block_diag(*[params[i + 2][0] for i in _HEAD_FIRST])
    b3 = jnp.concatenate([params[i + 2][1] for i in _HEAD_FIRST], axis=1)

    cast = lambda w: w.astype(compute_dtype)
    # Biases stay f32 (added to the f32 accumulator).
    return (cast(w0), b0.astype(jnp.float32),
            cast(w1), b1.astype(jnp.float32),
            cast(w2), b2.astype(jnp.float32),
            cast(w3), b3.astype(jnp.float32))


# ---------------------------------------------------------------------------
# Wrapper
# ---------------------------------------------------------------------------
def policy_ensemble_forward(x, packed, output_size):
    """packed = pack_params(...) output.  Returns (h0, h1, h2, h3, h4, ha)."""
    w0, b0, w1, b1, w2, b2, w3, b3 = packed
    B = x.shape[0]
    n_out = 5 * output_size + 1

    vmem = pl.BlockSpec(memory_space=pltpu.MemorySpace.VMEM)
    kernel = functools.partial(_policy_ensemble_kernel,
                               sigmoid_start=5 * output_size)

    out = pl.pallas_call(
        kernel,
        out_shape=jax.ShapeDtypeStruct((B, n_out), jnp.float32),
        in_specs=[vmem] * 9,
        out_specs=vmem,
    )(x, w0, b0, w1, b1, w2, b2, w3, b3)

    heads = tuple(out[:, i * output_size:(i + 1) * output_size]
                  for i in range(5))
    ha = out[:, 5 * output_size:]
    return (*heads, ha)


# ---------------------------------------------------------------------------
# Deterministic parameter construction (shapes follow the PyTorch __init__)
# ---------------------------------------------------------------------------
def make_params(key, input_size, output_size):
    # (in, out, bias_mean): bias_mean != None reproduces the special
    # torch.nn.init.normal_ calls on the fc3_* layers; other layers get a
    # small deterministic normal init (shape-compatible with PyTorch default).
    layer_defs = [
        (input_size, 16, None),                                     # fc0
        (16, 16, None), (16, 8, None), (8, output_size, 0.0),        # head 0
        (16, 32, None), (32, 16, None), (16, output_size, 0.25),     # head 1
        (16, 64, None), (64, 32, None), (32, output_size, -0.5),     # head 2
        (16, 128, None), (128, 64, None), (64, output_size, 1.75),   # head 3
        (16, 256, None), (256, 128, None), (128, output_size, 1.0),  # head 4
        (16, 64, None), (64, 32, None), (32, 1, -4.0),                # aux head
    ]
    params = []
    for (din, dout, bias_mean) in layer_defs:
        key, kw, kb = jax.random.split(key, 3)
        if bias_mean is None:
            w = 0.1 * jax.random.normal(kw, (din, dout), jnp.float32)
            b = 0.1 * jax.random.normal(kb, (1, dout), jnp.float32)
        else:
            w = 0.01 * jax.random.normal(kw, (din, dout), jnp.float32)
            b = bias_mean + 0.01 * jax.random.normal(kb, (1, dout), jnp.float32)
        params.append((w, b))
    return params


# Pure-JAX reference (mirrors the PyTorch forward exactly).
def reference_forward(x, params):
    def lin(v, i):
        w, b = params[i]
        return v @ w + b

    relu = lambda v: jnp.maximum(v, 0.0)
    l0 = relu(lin(x, 0))

    def head(i):
        h = relu(lin(l0, i))
        h = relu(lin(h, i + 1))
        return lin(h, i + 2)

    outs = [head(i) for i in _HEAD_FIRST[:-1]]
    ha = jax.nn.sigmoid(head(_HEAD_FIRST[-1]))
    return (*outs, ha)


if __name__ == "__main__":
    INPUT_SIZE = 16
    OUTPUT_SIZE = 4
    BATCH = 8  # multiple of 8 so f32 sublanes are fully used

    key = jax.random.PRNGKey(0)
    kx, kp = jax.random.split(key)
    x = jax.random.normal(kx, (BATCH, INPUT_SIZE), jnp.float32)
    params = make_params(kp, INPUT_SIZE, OUTPUT_SIZE)
    refs = reference_forward(x, params)

    # f32-operand path: exact check against the pure-JAX reference.
    packed_f32 = pack_params(params, jnp.float32)
    outs_f32 = jax.block_until_ready(
        policy_ensemble_forward(x, packed_f32, OUTPUT_SIZE))
    for o, r in zip(outs_f32, refs):
        assert o.shape == r.shape
        assert jnp.allclose(o, r, atol=1e-5, rtol=1e-5), "f32 mismatch vs reference"

    # bf16-MXU path (optimized default): f32 accumulation, relaxed tolerance.
    packed_bf16 = pack_params(params, jnp.bfloat16)
    outs_bf16 = jax.block_until_ready(
        policy_ensemble_forward(x, packed_bf16, OUTPUT_SIZE))
    for o, r in zip(outs_bf16, refs):
        assert o.shape == r.shape
        assert jnp.allclose(o, r, atol=5e-2, rtol=5e-2), "bf16 mismatch vs reference"

    print("KERNEL_OK")
</pallas_src>

<mosaic_0001>
module attributes {stable_mosaic.version = 11 : i64} {
  func.func @_policy_ensemble_kernel(%arg0: memref<8x16xf32, #tpu.memory_space<vmem>>, %arg1: memref<16x16xf32, #tpu.memory_space<vmem>>, %arg2: memref<1x16xf32, #tpu.memory_space<vmem>>, %arg3: memref<16x560xf32, #tpu.memory_space<vmem>>, %arg4: memref<1x560xf32, #tpu.memory_space<vmem>>, %arg5: memref<560x280xf32, #tpu.memory_space<vmem>>, %arg6: memref<1x280xf32, #tpu.memory_space<vmem>>, %arg7: memref<280x21xf32, #tpu.memory_space<vmem>>, %arg8: memref<1x21xf32, #tpu.memory_space<vmem>>, %arg9: memref<8x21xf32, #tpu.memory_space<vmem>>) attributes {dimension_semantics = [], scalar_prefetch = 0 : i64, scratch_operands = 0 : i64, tpu.core_type = #tpu.core_type<tc>} {
    %c0 = arith.constant 0 : index
    %c0_0 = arith.constant 0 : index
    %0 = vector.load %arg0[%c0, %c0_0] : memref<8x16xf32, #tpu.memory_space<vmem>>, vector<8x16xf32>
    %c0_1 = arith.constant 0 : index
    %c0_2 = arith.constant 0 : index
    %1 = vector.load %arg1[%c0_1, %c0_2] : memref<16x16xf32, #tpu.memory_space<vmem>>, vector<16x16xf32>
    %cst = arith.constant dense<0.000000e+00> : vector<8x16xf32>
    %2 = tpu.matmul %0, %1, %cst {dimension_numbers = #tpu.dot_dimension_numbers<[1], [0], [0], [1], [0, 0, 1, 1], [], []>} : vector<8x16xf32>, vector<16x16xf32>, vector<8x16xf32> -> vector<8x16xf32>
    %c0_3 = arith.constant 0 : index
    %c0_4 = arith.constant 0 : index
    %3 = vector.load %arg2[%c0_3, %c0_4] : memref<1x16xf32, #tpu.memory_space<vmem>>, vector<1x16xf32>
    %4 = vector.broadcast %3 : vector<1x16xf32> to vector<8x16xf32>
    %5 = arith.addf %2, %4 : vector<8x16xf32>
    %cst_5 = arith.constant 0.000000e+00 : f32
    %6 = vector.broadcast %cst_5 : f32 to vector<8x16xf32>
    %7 = arith.maximumf %5, %6 : vector<8x16xf32>
    %c0_6 = arith.constant 0 : index
    %c0_7 = arith.constant 0 : index
    %8 = vector.load %arg3[%c0_6, %c0_7] : memref<16x560xf32, #tpu.memory_space<vmem>>, vector<16x560xf32>
    %cst_8 = arith.constant dense<0.000000e+00> : vector<8x560xf32>
    %9 = tpu.matmul %7, %8, %cst_8 {dimension_numbers = #tpu.dot_dimension_numbers<[1], [0], [0], [1], [0, 0, 1, 1], [], []>} : vector<8x16xf32>, vector<16x560xf32>, vector<8x560xf32> -> vector<8x560xf32>
    %c0_9 = arith.constant 0 : index
    %c0_10 = arith.constant 0 : index
    %10 = vector.load %arg4[%c0_9, %c0_10] : memref<1x560xf32, #tpu.memory_space<vmem>>, vector<1x560xf32>
    %11 = vector.broadcast %10 : vector<1x560xf32> to vector<8x560xf32>
    %12 = arith.addf %9, %11 : vector<8x560xf32>
    %cst_11 = arith.constant 0.000000e+00 : f32
    %13 = vector.broadcast %cst_11 : f32 to vector<8x560xf32>
    %14 = arith.maximumf %12, %13 : vector<8x560xf32>
    %c0_12 = arith.constant 0 : index
    %c0_13 = arith.constant 0 : index
    %15 = vector.load %arg5[%c0_12, %c0_13] : memref<560x280xf32, #tpu.memory_space<vmem>>, vector<560x280xf32>
    %cst_14 = arith.constant dense<0.000000e+00> : vector<8x280xf32>
    %16 = tpu.matmul %14, %15, %cst_14 {dimension_numbers = #tpu.dot_dimension_numbers<[1], [0], [0], [1], [0, 0, 1, 1], [], []>} : vector<8x560xf32>, vector<560x280xf32>, vector<8x280xf32> -> vector<8x280xf32>
    %c0_15 = arith.constant 0 : index
    %c0_16 = arith.constant 0 : index
    %17 = vector.load %arg6[%c0_15, %c0_16] : memref<1x280xf32, #tpu.memory_space<vmem>>, vector<1x280xf32>
    %18 = vector.broadcast %17 : vector<1x280xf32> to vector<8x280xf32>
    %19 = arith.addf %16, %18 : vector<8x280xf32>
    %cst_17 = arith.constant 0.000000e+00 : f32
    %20 = vector.broadcast %cst_17 : f32 to vector<8x280xf32>
    %21 = arith.maximumf %19, %20 : vector<8x280xf32>
    %c0_18 = arith.constant 0 : index
    %c0_19 = arith.constant 0 : index
    %22 = vector.load %arg7[%c0_18, %c0_19] : memref<280x21xf32, #tpu.memory_space<vmem>>, vector<280x21xf32>
    %cst_20 = arith.constant dense<0.000000e+00> : vector<8x21xf32>
    %23 = tpu.matmul %21, %22, %cst_20 {dimension_numbers = #tpu.dot_dimension_numbers<[1], [0], [0], [1], [0, 0, 1, 1], [], []>} : vector<8x280xf32>, vector<280x21xf32>, vector<8x21xf32> -> vector<8x21xf32>
    %c0_21 = arith.constant 0 : index
    %c0_22 = arith.constant 0 : index
    %24 = vector.load %arg8[%c0_21, %c0_22] : memref<1x21xf32, #tpu.memory_space<vmem>>, vector<1x21xf32>
    %25 = vector.broadcast %24 : vector<1x21xf32> to vector<8x21xf32>
    %26 = arith.addf %23, %25 : vector<8x21xf32>
    %cst_23 = arith.constant 0.000000e+00 : f32
    %27 = vector.broadcast %cst_23 : f32 to vector<8x21xf32>
    %28 = arith.subf %27, %26 : vector<8x21xf32>
    %29 = math.exp %28 : vector<8x21xf32>
    %cst_24 = arith.constant 1.000000e+00 : f32
    %30 = vector.broadcast %cst_24 : f32 to vector<8x21xf32>
    %31 = arith.addf %30, %29 : vector<8x21xf32>
    %32 = tpu.reciprocal %31 : vector<8x21xf32> -> vector<8x21xf32>
    %33 = tpu.iota {dimensions = array<i32: 1>} : vector<8x21xi32>
    %c20_i32 = arith.constant 20 : i32
    %34 = vector.broadcast %c20_i32 : i32 to vector<8x21xi32>
    %35 = arith.cmpi sge, %33, %34 : vector<8x21xi32>
    %36 = arith.select %35, %32, %26 : vector<8x21xi1>, vector<8x21xf32>
    %c0_25 = arith.constant 0 : index
    %c0_26 = arith.constant 0 : index
    %37 = vector.load %arg9[%c0_25, %c0_26] : memref<8x21xf32, #tpu.memory_space<vmem>>, vector<8x21xf32>
    tpu.vector_store %arg9[%c0_25, %c0_26], %36 {strides = array<i32>} : memref<8x21xf32, #tpu.memory_space<vmem>>, vector<8x21xf32>,
    return
  }
}

</mosaic_0001>

<bundles_post_ra>
// kernel: tpu_custom_call.1
= control target key start
LH: loop header
LB: loop body
LE: loop exit
PB: predicated region body
PF: predicated region fallthrough
CT: control target
= control target key end

     0   :  { %v1441_v1 = vmov 0.0   ;;  %vm1442_vm0 = vmmov 0   ;;  %s2362_s0 = inlined_call_operand.vmem [shape: f32[8,16], index: 0, kind: input, shape index: {}]   ;;  %s2363_s1 = inlined_call_operand.vmem [shape: f32[16,16], index: 1, kind: input, shape index: {}]   ;;  %s2364_s2 = inlined_call_operand.vmem [shape: f32[1,16], index: 2, kind: input, shape index: {}]   ;;  %s2365_s3 = inlined_call_operand.vmem [shape: f32[16,560], index: 3, kind: input, shape index: {}]   ;;  %s2366_s4 = inlined_call_operand.vmem [shape: f32[1,560], index: 4, kind: input, shape index: {}]   ;;  %s2367_s5 = inlined_call_operand.vmem [shape: f32[560,280], index: 5, kind: input, shape index: {}]   ;;  %s2368_s6 = inlined_call_operand.vmem [shape: f32[1,280], index: 6, kind: input, shape index: {}]   ;;  %s2369_s7 = inlined_call_operand.vmem [shape: f32[280,21], index: 7, kind: input, shape index: {}]   ;;  %s2370_s8 = inlined_call_operand.vmem [shape: f32[1,21], index: 8, kind: input, shape index: {}]   ;;  %s2371_s9 = inlined_call_operand.hbm [shape: f32[8,21], index: 9, kind: output, shape index: {}]  }
   0x1   :  { %v35_v0 = vld [vmem:[%s2363_s1 + $0x8] sm:$0xff]  ;;  %1374 = vmatprep.subr.mxu0 %v1441_v1  ;;  %v34_v2 = vld [vmem:[%s2363_s1] sm:$0xff]  ;;  %1378 = vmatprep.mubr.msk.f32.mxu0 %vm1442_vm0, %v1441_v1 }
   0x2   :  { %14 = vsyncpa [#allocation3], 0  ;;  %1375 = vmatpush3.msra.mxu0 %v35_v0  ;;  %v33_v3 = vld [vmem:[%s2362_s0] sm:$0xff]  ;;  %vm43_vm1 = vcmask 130048   ;;  %222 = vmatprep.mubr.f32.mxu1 %v1441_v1  ;;  %v124_v5 = vld [vmem:[%s2365_s3 + $0x30] sm:$0xff]  ;;  %vm602_vm2 = vcmask 392192  }
   0x3   :  { %1376 = vmatprep.subr.mxu0 %v1441_v1  ;;  %v126_v4 = vld [vmem:[%s2365_s3 + $0x40] sm:$0xff]  ;;  %186 = vmatprep.subr.mxu1 %v124_v5  ;;  %v125_v6 = vld [vmem:[%s2365_s3 + $0x38] sm:$0xff]  ;;  %v123_v7 = vld [vmem:[%s2365_s3 + $0x28] sm:$0xff]  ;;  %vm1074_vm3 = vcmask 195584   ;;  %s1443_s19 = smov [#allocation2]   ;;  %vm1227_vm5 = vcmask 171008  }
   0x4   :  { %1377 = vmatpush3.msra.mxu0 %v34_v2  ;;  %187 = vmatpush1.msra.mxu1 %v123_v7  ;;  %v121_v8 = vld [vmem:[%s2365_s3 + $0x18] sm:$0xff]  ;;  %v119_v9 = vld [vmem:[%s2365_s3 + $0x8] sm:$0xff]  ;;  %v120_v10 = vld [vmem:[%s2365_s3 + $0x10] sm:$0xff]  ;;  %s1235_s20 = sshll.u32 %s1443_s19, 4  ;;  %s1236_s20 = int_to_ptr.vmem [resolvable:$true] %s1235_s20 }
   0x5   :  { %1379 = vmatmul.mubr.msk.f32.vlgmr.msra.gmra.mxu0 %vm43_vm1, %v33_v3  ;;  %257 = vmatprep.subr.mxu0 %v126_v4  ;;  %v118_v11 = vld [vmem:[%s2365_s3] sm:$0xff]  ;;  %v421_v12 = vld [vmem:[%s2367_s5 + $0x170] sm:$0xff]  ;;  %v127_v18 = vld [vmem:[%s2365_s3 + $0x48] sm:$0xff]  ;;  %p1424_p1 = scmp.lt.s32.totalorder %s1236_s20, %s1236_s20 }
   0x6   :  { %293 = vmatprep.mubr.f32.mxu0 %v1441_v1  ;;  %258 = vmatpush1.msra.mxu0 %v125_v6  ;;  %v1243_v13 = vld [vmem:[%s2364_s2] ss:$0 sm:$0xff]  ;;  %v420_v19 = vld [vmem:[%s2367_s5 + $0x168] sm:$0xff]  ;;  %v418_v21 = vld [vmem:[%s2367_s5 + $0x158] sm:$0xff] }
   0x7   :  { %259 = vmatprep.subr.mxu0 %v121_v8  ;;  %188 = vmatprep.subr.mxu1 %v119_v9  ;;  %v122_v20 = vld [vmem:[%s2365_s3 + $0x20] sm:$0xff]  ;;  %v517_v22 = vld [vmem:[%s2367_s5 + $0x470] sm:$0xff]  ;;  %v516_v23 = vld [vmem:[%s2367_s5 + $0x468] sm:$0xff] }
   0x8   :  { %260 = vmatpush1.msra.mxu0 %v120_v10  ;;  %189 = vmatpush1.msra.mxu1 %v118_v11  ;;  %v417_v24 = vld [vmem:[%s2367_s5 + $0x150] sm:$0xff]  ;;  %v514_v25 = vld [vmem:[%s2367_s5 + $0x458] sm:$0xff]  ;;  %v415_v26 = vld [vmem:[%s2367_s5 + $0x140] sm:$0xff] }
   0x9   :  { %1381 = vmatprep.subr.mxu1 %v1441_v1  ;;  %606 = vmatprep.subr.mxu0 %v421_v12  ;;  %v513_v27 = vld [vmem:[%s2367_s5 + $0x450] sm:$0xff]  ;;  %v414_v28 = vld [vmem:[%s2367_s5 + $0x138] sm:$0xff]  ;;  %v511_v29 = vld [vmem:[%s2367_s5 + $0x440] sm:$0xff] }
   0xa   :  { %v412_v30 = vld [vmem:[%s2367_s5 + $0x128] sm:$0xff]  ;;  %v510_v31 = vld [vmem:[%s2367_s5 + $0x438] sm:$0xff]  ;;  %v411_v32 = vld [vmem:[%s2367_s5 + $0x120] sm:$0xff] }
   0xb   :  { %v508_v33 = vld [vmem:[%s2367_s5 + $0x428] sm:$0xff]  ;;  %v409_v34 = vld [vmem:[%s2367_s5 + $0x110] sm:$0xff]  ;;  %v507_v35 = vld [vmem:[%s2367_s5 + $0x420] sm:$0xff] }
   0xc   :  { %v408_v36 = vld [vmem:[%s2367_s5 + $0x108] sm:$0xff]  ;;  %v505_v37 = vld [vmem:[%s2367_s5 + $0x410] sm:$0xff]  ;;  %v406_v38 = vld [vmem:[%s2367_s5 + $0xf8] sm:$0xff] }
   0xd   :  { %v504_v39 = vld [vmem:[%s2367_s5 + $0x408] sm:$0xff]  ;;  %v405_v40 = vld [vmem:[%s2367_s5 + $0xf0] sm:$0xff]  ;;  %v502_v41 = vld [vmem:[%s2367_s5 + $0x3f8] sm:$0xff] }
   0xe   :  { %v403_v42 = vld [vmem:[%s2367_s5 + $0xe0] sm:$0xff]  ;;  %v501_v43 = vld [vmem:[%s2367_s5 + $0x3f0] sm:$0xff]  ;;  %v402_v44 = vld [vmem:[%s2367_s5 + $0xd8] sm:$0xff] }
   0xf   :  { %v499_v45 = vld [vmem:[%s2367_s5 + $0x3e0] sm:$0xff]  ;;  %v400_v46 = vld [vmem:[%s2367_s5 + $0xc8] sm:$0xff]  ;;  %v498_v47 = vld [vmem:[%s2367_s5 + $0x3d8] sm:$0xff] }
  0x10   :  { %v399_v48 = vld [vmem:[%s2367_s5 + $0xc0] sm:$0xff]  ;;  %v496_v49 = vld [vmem:[%s2367_s5 + $0x3c8] sm:$0xff]  ;;  %v397_v50 = vld [vmem:[%s2367_s5 + $0xb0] sm:$0xff] }
  0x11   :  { %v495_v51 = vld [vmem:[%s2367_s5 + $0x3c0] sm:$0xff]  ;;  %v396_v52 = vld [vmem:[%s2367_s5 + $0xa8] sm:$0xff]  ;;  %v493_v53 = vld [vmem:[%s2367_s5 + $0x3b0] sm:$0xff] }
  0x12   :  { %v394_v54 = vld [vmem:[%s2367_s5 + $0x98] sm:$0xff]  ;;  %v492_v55 = vld [vmem:[%s2367_s5 + $0x3a8] sm:$0xff]  ;;  %v393_v56 = vld [vmem:[%s2367_s5 + $0x90] sm:$0xff] }
  0x13   :  { %v490_v57 = vld [vmem:[%s2367_s5 + $0x398] sm:$0xff]  ;;  %v391_v58 = vld [vmem:[%s2367_s5 + $0x80] sm:$0xff]  ;;  %v489_v59 = vld [vmem:[%s2367_s5 + $0x390] sm:$0xff] }
  0x14   :  { %v390_v60 = vld [vmem:[%s2367_s5 + $0x78] sm:$0xff]  ;;  %v487_v61 = vld [vmem:[%s2367_s5 + $0x380] sm:$0xff]  ;;  %v388_v62 = vld [vmem:[%s2367_s5 + $0x68] sm:$0xff] }
  0x15   :  { %v486_v63 = vld [vmem:[%s2367_s5 + $0x378] sm:$0xff]  ;;  %v387_v0 = vld [vmem:[%s2367_s5 + $0x60] sm:$0xff]  ;;  %v484_v2 = vld [vmem:[%s2367_s5 + $0x368] sm:$0xff] }
  0x16   :  { %v385_v3 = vld [vmem:[%s2367_s5 + $0x50] sm:$0xff]  ;;  %v483_v4 = vld [vmem:[%s2367_s5 + $0x360] sm:$0xff]  ;;  %v384_v5 = vld [vmem:[%s2367_s5 + $0x48] sm:$0xff] }
  0x17   :  { %v481_v6 = vld [vmem:[%s2367_s5 + $0x350] sm:$0xff]  ;;  %v382_v7 = vld [vmem:[%s2367_s5 + $0x38] sm:$0xff]  ;;  %v480_v8 = vld [vmem:[%s2367_s5 + $0x348] sm:$0xff] }
  0x18   :  { %v381_v9 = vld [vmem:[%s2367_s5 + $0x30] sm:$0xff]  ;;  %v478_v10 = vld [vmem:[%s2367_s5 + $0x338] sm:$0xff]  ;;  %v379_v11 = vld [vmem:[%s2367_s5 + $0x20] sm:$0xff] }
  0x19   :  { %v477_v12 = vld [vmem:[%s2367_s5 + $0x330] sm:$0xff] }
  0xc5   :  { %v113_v14 = vpop.f32.mrf.mxu0 }
  0xc6   :  { %v114_v15 = vadd.f32 %v1243_v13, %v113_v14  ;;  %v378_v13 = vld [vmem:[%s2367_s5 + $0x18] sm:$0xff]  ;;  %v475_v14 = vld [vmem:[%s2367_s5 + $0x320] sm:$0xff] }
  0xc7   :  { %v1380_v16 = vpop.f32.mrf.mxu0 }
  0xc8   :  { %v117_v17 = vmax.f32 %v114_v15, 0.0  ;;  %v376_v15 = vld [vmem:[%s2367_s5 + $0x8] sm:$0xff]  ;;  %v474_v16 = vld [vmem:[%s2367_s5 + $0x318] sm:$0xff] }
  0xca   :  { %1245 = vmatmul.mubr.msk.f32.vlgmr.msra.gmra.mxu1 %vm43_vm1, %v117_v17  ;;  %1246 = vmatmul.mubr.msk.f32.vlgmr.msra.gmra.mxu0 %vm43_vm1, %v117_v17 }
  0xcb   :  { %1382 = vmatpush3.msra.mxu1 %v127_v18  ;;  %1385 = vmatprep.mubr.msk.f32.mxu1 %vm1442_vm0, %v1441_v1  ;;  %v472_v18 = vld [vmem:[%s2367_s5 + $0x308] sm:$0xff] }
  0xcc   :  { %1383 = vmatprep.subr.mxu1 %v1441_v1  ;;  %607 = vmatpush1.msra.mxu0 %v420_v19  ;;  %v469_v19 = vld [vmem:[%s2367_s5 + $0x2f0] sm:$0xff] }
  0xcd   :  { %1384 = vmatpush3.msra.mxu1 %v122_v20  ;;  %608 = vmatprep.subr.mxu0 %v418_v21  ;;  %v471_v20 = vld [vmem:[%s2367_s5 + $0x300] sm:$0xff]  ;;  %v468_v21 = vld [vmem:[%s2367_s5 + $0x2e8] sm:$0xff] }
  0xce   :  { %1386 = vmatmul.mubr.msk.f32.vlgmr.msra.gmra.mxu1 %vm43_vm1, %v117_v17  ;;  %677 = vmatprep.subr.mxu1 %v517_v22  ;;  %v375_v17 = vld [vmem:[%s2367_s5] sm:$0xff]  ;;  %v565_v22 = vld [vmem:[%s2367_s5 + $0x5f0] sm:$0xff] }
  0xcf   :  { %678 = vmatpush1.msra.mxu1 %v516_v23  ;;  %609 = vmatpush1.msra.mxu0 %v417_v24  ;;  %v466_v23 = vld [vmem:[%s2367_s5 + $0x2d8] sm:$0xff]  ;;  %v564_v24 = vld [vmem:[%s2367_s5 + $0x5e8] sm:$0xff] }
  0xd0   :  { %679 = vmatprep.subr.mxu1 %v514_v25  ;;  %610 = vmatprep.subr.mxu0 %v415_v26  ;;  %v465_v25 = vld [vmem:[%s2367_s5 + $0x2d0] sm:$0xff]  ;;  %v562_v26 = vld [vmem:[%s2367_s5 + $0x5d8] sm:$0xff] }
  0xd1   :  { %680 = vmatpush1.msra.mxu1 %v513_v27  ;;  %611 = vmatpush1.msra.mxu0 %v414_v28  ;;  %v463_v27 = vld [vmem:[%s2367_s5 + $0x2c0] sm:$0xff]  ;;  %v561_v28 = vld [vmem:[%s2367_s5 + $0x5d0] sm:$0xff] }
  0xd2   :  { %681 = vmatprep.subr.mxu1 %v511_v29  ;;  %612 = vmatprep.subr.mxu0 %v412_v30  ;;  %v462_v29 = vld [vmem:[%s2367_s5 + $0x2b8] sm:$0xff]  ;;  %v559_v30 = vld [vmem:[%s2367_s5 + $0x5c0] sm:$0xff] }
  0xd3   :  { %682 = vmatpush1.msra.mxu1 %v510_v31  ;;  %613 = vmatpush1.msra.mxu0 %v411_v32  ;;  %v460_v31 = vld [vmem:[%s2367_s5 + $0x2a8] sm:$0xff]  ;;  %v558_v32 = vld [vmem:[%s2367_s5 + $0x5b8] sm:$0xff] }
  0xd4   :  { %683 = vmatprep.subr.mxu1 %v508_v33  ;;  %614 = vmatprep.subr.mxu0 %v409_v34  ;;  %v459_v33 = vld [vmem:[%s2367_s5 + $0x2a0] sm:$0xff]  ;;  %v556_v34 = vld [vmem:[%s2367_s5 + $0x5a8] sm:$0xff] }
  0xd5   :  { %684 = vmatpush1.msra.mxu1 %v507_v35  ;;  %615 = vmatpush1.msra.mxu0 %v408_v36  ;;  %v457_v35 = vld [vmem:[%s2367_s5 + $0x290] sm:$0xff]  ;;  %v555_v36 = vld [vmem:[%s2367_s5 + $0x5a0] sm:$0xff] }
  0xd6   :  { %685 = vmatprep.subr.mxu1 %v505_v37  ;;  %616 = vmatprep.subr.mxu0 %v406_v38  ;;  %v456_v37 = vld [vmem:[%s2367_s5 + $0x288] sm:$0xff]  ;;  %v553_v38 = vld [vmem:[%s2367_s5 + $0x590] sm:$0xff] }
  0xd7   :  { %686 = vmatpush1.msra.mxu1 %v504_v39  ;;  %617 = vmatpush1.msra.mxu0 %v405_v40  ;;  %v454_v39 = vld [vmem:[%s2367_s5 + $0x278] sm:$0xff]  ;;  %v552_v40 = vld [vmem:[%s2367_s5 + $0x588] sm:$0xff] }
  0xd8   :  { %687 = vmatprep.subr.mxu1 %v502_v41  ;;  %618 = vmatprep.subr.mxu0 %v403_v42  ;;  %v453_v41 = vld [vmem:[%s2367_s5 + $0x270] sm:$0xff]  ;;  %v550_v42 = vld [vmem:[%s2367_s5 + $0x578] sm:$0xff] }
  0xd9   :  { %688 = vmatpush1.msra.mxu1 %v501_v43  ;;  %619 = vmatpush1.msra.mxu0 %v402_v44  ;;  %v451_v43 = vld [vmem:[%s2367_s5 + $0x260] sm:$0xff]  ;;  %v549_v44 = vld [vmem:[%s2367_s5 + $0x570] sm:$0xff] }
  0xda   :  { %689 = vmatprep.subr.mxu1 %v499_v45  ;;  %620 = vmatprep.subr.mxu0 %v400_v46  ;;  %v450_v45 = vld [vmem:[%s2367_s5 + $0x258] sm:$0xff]  ;;  %v547_v46 = vld [vmem:[%s2367_s5 + $0x560] sm:$0xff] }
  0xdb   :  { %690 = vmatpush1.msra.mxu1 %v498_v47  ;;  %621 = vmatpush1.msra.mxu0 %v399_v48  ;;  %v448_v47 = vld [vmem:[%s2367_s5 + $0x248] sm:$0xff]  ;;  %v546_v48 = vld [vmem:[%s2367_s5 + $0x558] sm:$0xff] }
  0xdc   :  { %691 = vmatprep.subr.mxu1 %v496_v49  ;;  %622 = vmatprep.subr.mxu0 %v397_v50  ;;  %v447_v49 = vld [vmem:[%s2367_s5 + $0x240] sm:$0xff]  ;;  %v544_v50 = vld [vmem:[%s2367_s5 + $0x548] sm:$0xff] }
  0xdd   :  { %692 = vmatpush1.msra.mxu1 %v495_v51  ;;  %623 = vmatpush1.msra.mxu0 %v396_v52  ;;  %v445_v51 = vld [vmem:[%s2367_s5 + $0x230] sm:$0xff]  ;;  %v543_v52 = vld [vmem:[%s2367_s5 + $0x540] sm:$0xff] }
  0xde   :  { %693 = vmatprep.subr.mxu1 %v493_v53  ;;  %624 = vmatprep.subr.mxu0 %v394_v54  ;;  %v444_v53 = vld [vmem:[%s2367_s5 + $0x228] sm:$0xff]  ;;  %v541_v54 = vld [vmem:[%s2367_s5 + $0x530] sm:$0xff] }
  0xdf   :  { %694 = vmatpush1.msra.mxu1 %v492_v55  ;;  %625 = vmatpush1.msra.mxu0 %v393_v56  ;;  %v442_v55 = vld [vmem:[%s2367_s5 + $0x218] sm:$0xff]  ;;  %v540_v56 = vld [vmem:[%s2367_s5 + $0x528] sm:$0xff] }
  0xe0   :  { %695 = vmatprep.subr.mxu1 %v490_v57  ;;  %626 = vmatprep.subr.mxu0 %v391_v58  ;;  %v441_v57 = vld [vmem:[%s2367_s5 + $0x210] sm:$0xff]  ;;  %v538_v58 = vld [vmem:[%s2367_s5 + $0x518] sm:$0xff] }
  0xe1   :  { %696 = vmatpush1.msra.mxu1 %v489_v59  ;;  %627 = vmatpush1.msra.mxu0 %v390_v60  ;;  %v439_v59 = vld [vmem:[%s2367_s5 + $0x200] sm:$0xff]  ;;  %v537_v60 = vld [vmem:[%s2367_s5 + $0x510] sm:$0xff] }
  0xe2   :  { %697 = vmatprep.subr.mxu1 %v487_v61  ;;  %628 = vmatprep.subr.mxu0 %v388_v62  ;;  %v438_v61 = vld [vmem:[%s2367_s5 + $0x1f8] sm:$0xff]  ;;  %v535_v62 = vld [vmem:[%s2367_s5 + $0x500] sm:$0xff] }
  0xe3   :  { %698 = vmatpush1.msra.mxu1 %v486_v63  ;;  %629 = vmatpush1.msra.mxu0 %v387_v0  ;;  %v436_v63 = vld [vmem:[%s2367_s5 + $0x1e8] sm:$0xff]  ;;  %v534_v0 = vld [vmem:[%s2367_s5 + $0x4f8] sm:$0xff] }
  0xe4   :  { %699 = vmatprep.subr.mxu1 %v484_v2  ;;  %630 = vmatprep.subr.mxu0 %v385_v3  ;;  %v435_v2 = vld [vmem:[%s2367_s5 + $0x1e0] sm:$0xff]  ;;  %v532_v3 = vld [vmem:[%s2367_s5 + $0x4e8] sm:$0xff] }
  0xe5   :  { %700 = vmatpush1.msra.mxu1 %v483_v4  ;;  %631 = vmatpush1.msra.mxu0 %v384_v5  ;;  %v433_v4 = vld [vmem:[%s2367_s5 + $0x1d0] sm:$0xff]  ;;  %v531_v5 = vld [vmem:[%s2367_s5 + $0x4e0] sm:$0xff] }
  0xe6   :  { %701 = vmatprep.subr.mxu1 %v481_v6  ;;  %632 = vmatprep.subr.mxu0 %v382_v7  ;;  %v529_v6 = vld [vmem:[%s2367_s5 + $0x4d0] sm:$0xff]  ;;  %v432_v7 = vld [vmem:[%s2367_s5 + $0x1c8] sm:$0xff] }
  0xe7   :  { %702 = vmatpush1.msra.mxu1 %v480_v8  ;;  %633 = vmatpush1.msra.mxu0 %v381_v9  ;;  %v528_v8 = vld [vmem:[%s2367_s5 + $0x4c8] sm:$0xff]  ;;  %v430_v9 = vld [vmem:[%s2367_s5 + $0x1b8] sm:$0xff] }
  0xe8   :  { %703 = vmatprep.subr.mxu1 %v478_v10  ;;  %634 = vmatprep.subr.mxu0 %v379_v11  ;;  %v526_v10 = vld [vmem:[%s2367_s5 + $0x4b8] sm:$0xff]  ;;  %v429_v11 = vld [vmem:[%s2367_s5 + $0x1b0] sm:$0xff] }
  0xe9   :  { %704 = vmatpush1.msra.mxu1 %v477_v12  ;;  %635 = vmatpush1.msra.mxu0 %v378_v13  ;;  %v525_v12 = vld [vmem:[%s2367_s5 + $0x4b0] sm:$0xff]  ;;  %v427_v13 = vld [vmem:[%s2367_s5 + $0x1a0] sm:$0xff] }
  0xea   :  { %705 = vmatprep.subr.mxu1 %v475_v14  ;;  %636 = vmatprep.subr.mxu0 %v376_v15  ;;  %v523_v14 = vld [vmem:[%s2367_s5 + $0x4a0] sm:$0xff]  ;;  %v426_v15 = vld [vmem:[%s2367_s5 + $0x198] sm:$0xff] }
  0xeb   :  { %706 = vmatpush1.msra.mxu1 %v474_v16  ;;  %637 = vmatpush1.msra.mxu0 %v375_v17  ;;  %v522_v16 = vld [vmem:[%s2367_s5 + $0x498] sm:$0xff]  ;;  %v424_v17 = vld [vmem:[%s2367_s5 + $0x188] sm:$0xff] }
  0xec   :  { %707 = vmatprep.subr.mxu1 %v472_v18  ;;  %638 = vmatprep.subr.mxu0 %v469_v19  ;;  %v520_v18 = vld [vmem:[%s2367_s5 + $0x488] sm:$0xff]  ;;  %v423_v19 = vld [vmem:[%s2367_s5 + $0x180] sm:$0xff] }
  0xed   :  { %708 = vmatpush1.msra.mxu1 %v471_v20  ;;  %639 = vmatpush2.msra.mxu0 %v468_v21  ;;  %v519_v20 = vld [vmem:[%s2367_s5 + $0x480] sm:$0xff] }
  0xee   :  { %709 = vmatprep.subr.mxu1 %v565_v22  ;;  %640 = vmatprep.subr.mxu0 %v466_v23  ;;  %v583_v21 = vld [vmem:[%s2367_s5 + $0x680] sm:$0xff]  ;;  %v566_v22 = vld [vmem:[%s2367_s5 + $0x5f8] sm:$0xff]  ;;  %v130_v23 = vlaneseq }
  0xef   :  { %710 = vmatpush2.msra.mxu1 %v564_v24  ;;  %641 = vmatpush2.msra.mxu0 %v465_v25 }
  0xf0   :  { %711 = vmatprep.subr.mxu1 %v562_v26  ;;  %642 = vmatprep.subr.mxu0 %v463_v27  ;;  %v1941_v24 = vshrl.u32 %v130_v23, 7  ;;  %v128_v27 = vld [vmem:[%s2366_s4] sm:$0x1f] }
  0xf1   :  { %712 = vmatpush2.msra.mxu1 %v561_v28  ;;  %643 = vmatpush2.msra.mxu0 %v462_v29 }
  0xf2   :  { %713 = vmatprep.subr.mxu1 %v559_v30  ;;  %644 = vmatprep.subr.mxu0 %v460_v31  ;;  %v132_v25 = vsub.s32 0, %v1941_v24  ;;  %v140_v26 = vsub.s32 2, %v1941_v24  ;;  %v136_v28 = vsub.s32 1, %v1941_v24  ;;  %v144_v29 = vsub.s32 3, %v1941_v24 }
  0xf3   :  { %714 = vmatpush2.msra.mxu1 %v558_v32  ;;  %645 = vmatpush2.msra.mxu0 %v459_v33 }
  0xf4   :  { %715 = vmatprep.subr.mxu1 %v556_v34  ;;  %646 = vmatprep.subr.mxu0 %v457_v35  ;;  %v133_v30 = vrot.slane %v128_v27, %v132_v25  ;;  %v141_v31 = vrot.slane %v128_v27, %v140_v26  ;;  %v137_v32 = vrot.slane %v128_v27, %v136_v28 }
  0xf5   :  { %716 = vmatpush2.msra.mxu1 %v555_v36  ;;  %647 = vmatpush2.msra.mxu0 %v456_v37  ;;  %v145_v33 = vrot.slane %v128_v27, %v144_v29  ;;  %v539_v29 = vld [vmem:[%s2367_s5 + $0x520] sm:$0xff] }
  0xf6   :  { %717 = vmatprep.subr.mxu1 %v553_v38  ;;  %648 = vmatprep.subr.mxu0 %v454_v39 }
  0xf7   :  { %718 = vmatpush2.msra.mxu1 %v552_v40  ;;  %649 = vmatpush2.msra.mxu0 %v453_v41 }
  0xf8   :  { %719 = vmatprep.subr.mxu1 %v550_v42  ;;  %650 = vmatprep.subr.mxu0 %v451_v43 }
  0xf9   :  { %720 = vmatpush2.msra.mxu1 %v549_v44  ;;  %651 = vmatpush2.msra.mxu0 %v450_v45 }
  0xfa   :  { %721 = vmatprep.subr.mxu1 %v547_v46  ;;  %652 = vmatprep.subr.mxu0 %v448_v47 }
  0xfb   :  { %722 = vmatpush2.msra.mxu1 %v546_v48  ;;  %653 = vmatpush2.msra.mxu0 %v447_v49  ;;  %v582_v48 = vld [vmem:[%s2367_s5 + $0x678] sm:$0xff] }
  0xfc   :  { %723 = vmatprep.subr.mxu1 %v544_v50  ;;  %654 = vmatprep.subr.mxu0 %v445_v51  ;;  %v518_v49 = vld [vmem:[%s2367_s5 + $0x478] sm:$0xff]  ;;  %v148_v50 = vsub.s32 4, %v1941_v24  ;;  %v580_v51 = vld [vmem:[%s2367_s5 + $0x668] sm:$0xff] }
  0xfd   :  { %724 = vmatpush2.msra.mxu1 %v543_v52  ;;  %655 = vmatpush2.msra.mxu0 %v444_v53  ;;  %v563_v52 = vld [vmem:[%s2367_s5 + $0x5e0] sm:$0xff] }
  0xfe   :  { %725 = vmatprep.subr.mxu1 %v541_v54  ;;  %656 = vmatprep.subr.mxu0 %v442_v55  ;;  %v579_v53 = vld [vmem:[%s2367_s5 + $0x660] sm:$0xff]  ;;  %v577_v55 = vld [vmem:[%s2367_s5 + $0x650] sm:$0xff] }
  0xff   :  { %726 = vmatpush2.msra.mxu1 %v540_v56  ;;  %657 = vmatpush2.msra.mxu0 %v441_v57  ;;  %v515_v54 = vld [vmem:[%s2367_s5 + $0x460] sm:$0xff]  ;;  %v560_v56 = vld [vmem:[%s2367_s5 + $0x5c8] sm:$0xff] }
 0x100   :  { %727 = vmatprep.subr.mxu1 %v538_v58  ;;  %658 = vmatprep.subr.mxu0 %v439_v59  ;;  %v576_v57 = vld [vmem:[%s2367_s5 + $0x648] sm:$0xff]  ;;  %v149_v58 = vrot.slane %v128_v27, %v148_v50  ;;  %v461_v27 = vld [vmem:[%s2367_s5 + $0x2b0] sm:$0xff] }
 0x101   :  { %728 = vmatpush2.msra.mxu1 %v537_v60  ;;  %659 = vmatpush2.msra.mxu0 %v438_v61  ;;  %v512_v59 = vld [vmem:[%s2367_s5 + $0x448] sm:$0xff]  ;;  %v574_v60 = vld [vmem:[%s2367_s5 + $0x638] sm:$0xff]  ;;  %v557_v61 = vld [vmem:[%s2367_s5 + $0x5b0] sm:$0xff] }
 0x102   :  { %729 = vmatprep.subr.mxu1 %v535_v62  ;;  %660 = vmatprep.subr.mxu0 %v436_v63  ;;  %v573_v62 = vld [vmem:[%s2367_s5 + $0x630] sm:$0xff] }
 0x103   :  { %730 = vmatpush2.msra.mxu1 %v534_v0  ;;  %661 = vmatpush2.msra.mxu0 %v435_v2  ;;  %v509_v63 = vld [vmem:[%s2367_s5 + $0x430] sm:$0xff]  ;;  %v571_v0 = vld [vmem:[%s2367_s5 + $0x620] sm:$0xff]  ;;  %v554_v2 = vld [vmem:[%s2367_s5 + $0x598] sm:$0xff] }
 0x104   :  { %731 = vmatprep.subr.mxu1 %v532_v3  ;;  %662 = vmatprep.subr.mxu0 %v433_v4  ;;  %v570_v3 = vld [vmem:[%s2367_s5 + $0x618] sm:$0xff]  ;;  %v401_v50 = vld [vmem:[%s2367_s5 + $0xd0] sm:$0xff] }
 0x105   :  { %732 = vmatpush2.msra.mxu1 %v531_v5  ;;  %663 = vmatpush2.msra.mxu0 %v432_v7  ;;  %v506_v5 = vld [vmem:[%s2367_s5 + $0x418] sm:$0xff]  ;;  %v551_v7 = vld [vmem:[%s2367_s5 + $0x580] sm:$0xff] }
 0x106   :  { %733 = vmatprep.subr.mxu1 %v529_v6  ;;  %664 = vmatprep.subr.mxu0 %v430_v9  ;;  %v568_v6 = vld [vmem:[%s2367_s5 + $0x608] sm:$0xff]  ;;  %v503_v9 = vld [vmem:[%s2367_s5 + $0x400] sm:$0xff] }
 0x107   :  { %734 = vmatpush2.msra.mxu1 %v528_v8  ;;  %665 = vmatpush2.msra.mxu0 %v429_v11  ;;  %v567_v8 = vld [vmem:[%s2367_s5 + $0x600] sm:$0xff] }
 0x108   :  { %735 = vmatprep.subr.mxu1 %v526_v10  ;;  %666 = vmatprep.subr.mxu0 %v427_v13  ;;  %v470_v10 = vld [vmem:[%s2367_s5 + $0x2f8] sm:$0xff] }
 0x109   :  { %736 = vmatpush2.msra.mxu1 %v525_v12  ;;  %667 = vmatpush2.msra.mxu0 %v426_v15  ;;  %v548_v12 = vld [vmem:[%s2367_s5 + $0x568] sm:$0xff]  ;;  %v422_v13 = vld [vmem:[%s2367_s5 + $0x178] sm:$0xff]  ;;  %v467_v15 = vld [vmem:[%s2367_s5 + $0x2e0] sm:$0xff] }
 0x10a   :  { %737 = vmatprep.subr.mxu1 %v523_v14  ;;  %668 = vmatprep.subr.mxu0 %v424_v17  ;;  %v500_v14 = vld [vmem:[%s2367_s5 + $0x3e8] sm:$0xff]  ;;  %v419_v17 = vld [vmem:[%s2367_s5 + $0x160] sm:$0xff] }
 0x10b   :  { %738 = vmatpush2.msra.mxu1 %v522_v16  ;;  %669 = vmatpush2.msra.mxu0 %v423_v19  ;;  %v545_v16 = vld [vmem:[%s2367_s5 + $0x550] sm:$0xff]  ;;  %v464_v19 = vld [vmem:[%s2367_s5 + $0x2c8] sm:$0xff] }
 0x10c   :  { %739 = vmatprep.subr.mxu1 %v520_v18  ;;  %1293 = vmatprep.subr.mxu0 %v566_v22  ;;  %v497_v18 = vld [vmem:[%s2367_s5 + $0x3d0] sm:$0xff]  ;;  %v494_v22 = vld [vmem:[%s2367_s5 + $0x3b8] sm:$0xff] }
 0x10d   :  { %740 = vmatpush2.msra.mxu1 %v519_v20  ;;  %v542_v20 = vld [vmem:[%s2367_s5 + $0x538] sm:$0xff] }
 0x10e   :  { %768 = vmatprep.subr.mxu1 %v583_v21  ;;  %v416_v21 = vld [vmem:[%s2367_s5 + $0x148] sm:$0xff] }
 0x18a   :  { %v224_v34 = vpop.f32.mrf.mxu1  ;;  %v295_v35 = vpop.f32.mrf.mxu0 }
 0x18b   :  { %v1956_v36 = vadd.f32 %v224_v34, %v133_v30  ;;  %v1958_v37 = vadd.f32 %v295_v35, %v141_v31  ;;  %v413_v30 = vld [vmem:[%s2367_s5 + $0x130] sm:$0xff]  ;;  %v491_v31 = vld [vmem:[%s2367_s5 + $0x3a0] sm:$0xff]  ;;  %v410_v34 = vld [vmem:[%s2367_s5 + $0x118] sm:$0xff] }
 0x18c   :  { %v226_v38 = vpop.f32.mrf.mxu1  ;;  %v297_v39 = vpop.f32.mrf.mxu0  ;;  %v488_v35 = vld [vmem:[%s2367_s5 + $0x388] sm:$0xff] }
 0x18d   :  { %v1960_v40 = vadd.f32 %v226_v38, %v137_v32  ;;  %v298_v41 = vadd.f32 %v297_v39, %v145_v33  ;;  %v370_v45 = vmax.f32 %v1956_v36, 0.0  ;;  %v372_v46 = vmax.f32 %v1958_v37, 0.0  ;;  %v458_v32 = vld [vmem:[%s2367_s5 + $0x298] sm:$0xff]  ;;  %v536_v33 = vld [vmem:[%s2367_s5 + $0x508] sm:$0xff]  ;;  %v455_v38 = vld [vmem:[%s2367_s5 + $0x280] sm:$0xff] }
 0x18e   :  { %v366_v42 = vpop.f32.mrf.mxu1  ;;  %v533_v39 = vld [vmem:[%s2367_s5 + $0x4f0] sm:$0xff]  ;;  %v386_v37 = vld [vmem:[%s2367_s5 + $0x58] sm:$0xff] }
 0x18f   :  { %v371_v43 = vmax.f32 %v1960_v40, 0.0  ;;  %v373_v44 = vmax.f32 %v298_v41, 0.0  ;;  %v2023_v4 = vadd.f32 %v366_v42, %v149_v58  ;;  %v407_v40 = vld [vmem:[%s2367_s5 + $0x100] sm:$0xff]  ;;  %v485_v41 = vld [vmem:[%s2367_s5 + $0x370] sm:$0xff]  ;;  %v452_v42 = vld [vmem:[%s2367_s5 + $0x268] sm:$0xff] }
 0x190   :  { %v1387_v47 = vpop.f32.mrf.mxu1  ;;  %v395_v58 = vld [vmem:[%s2367_s5 + $0xa0] sm:$0xff]  ;;  %v578_v36 = vld [vmem:[%s2367_s5 + $0x658] sm:$0xff] }
 0x191   :  { %670 = vmatprep.mubr.f32.mxu0 %v371_v43  ;;  %741 = vmatprep.mubr.f32.mxu1 %v373_v44  ;;  %v374_v11 = vmax.f32 %v2023_v4, 0.0  ;;  %v482_v47 = vld [vmem:[%s2367_s5 + $0x358] sm:$0xff]  ;;  %v1040_v4 = vld [vmem:[%s2369_s7 + $0x40] sm:$0xff] }
 0x192   :  { %671 = vmatmul.mubr.f32.vlgmr.msra.gmra.mxu0 %v370_v45  ;;  %742 = vmatmul.mubr.f32.vlgmr.msra.gmra.mxu1 %v372_v46 }
 0x193   :  { %769 = vmatpush1.msra.mxu1 %v582_v48  ;;  %1294 = vmatpush3.msra.mxu0 %v518_v49  ;;  %v449_v48 = vld [vmem:[%s2367_s5 + $0x250] sm:$0xff]  ;;  %v527_v49 = vld [vmem:[%s2367_s5 + $0x4c0] sm:$0xff] }
 0x194   :  { %770 = vmatprep.subr.mxu1 %v580_v51  ;;  %1295 = vmatprep.subr.mxu0 %v563_v52  ;;  %v479_v51 = vld [vmem:[%s2367_s5 + $0x340] sm:$0xff]  ;;  %v446_v52 = vld [vmem:[%s2367_s5 + $0x238] sm:$0xff] }
 0x195   :  { %953 = vmatprep.mubr.f32.mxu0 %v373_v44  ;;  %771 = vmatpush1.msra.mxu1 %v579_v53  ;;  %v404_v44 = vld [vmem:[%s2367_s5 + $0xe8] sm:$0xff] }
 0x196   :  { %1296 = vmatpush3.msra.mxu0 %v515_v54  ;;  %772 = vmatprep.subr.mxu1 %v577_v55  ;;  %v524_v53 = vld [vmem:[%s2367_s5 + $0x4a8] sm:$0xff]  ;;  %v398_v54 = vld [vmem:[%s2367_s5 + $0xb8] sm:$0xff] }
 0x197   :  { %1297 = vmatprep.subr.mxu0 %v560_v56  ;;  %773 = vmatpush1.msra.mxu1 %v576_v57  ;;  %v476_v55 = vld [vmem:[%s2367_s5 + $0x328] sm:$0xff]  ;;  %v443_v56 = vld [vmem:[%s2367_s5 + $0x220] sm:$0xff]  ;;  %v521_v57 = vld [vmem:[%s2367_s5 + $0x490] sm:$0xff] }
 0x198   :  { %1298 = vmatpush3.msra.mxu0 %v512_v59  ;;  %774 = vmatprep.subr.mxu1 %v574_v60  ;;  %v473_v59 = vld [vmem:[%s2367_s5 + $0x310] sm:$0xff]  ;;  %v440_v60 = vld [vmem:[%s2367_s5 + $0x208] sm:$0xff] }
 0x199   :  { %1299 = vmatprep.subr.mxu0 %v557_v61  ;;  %775 = vmatpush1.msra.mxu1 %v573_v62  ;;  %v392_v61 = vld [vmem:[%s2367_s5 + $0x88] sm:$0xff]  ;;  %v1063_v62 = vld [vmem:[%s2369_s7 + $0xf8] sm:$0xff] }
 0x19a   :  { %1300 = vmatpush3.msra.mxu0 %v509_v63  ;;  %776 = vmatprep.subr.mxu1 %v571_v0  ;;  %v437_v63 = vld [vmem:[%s2367_s5 + $0x1f0] sm:$0xff]  ;;  %v1047_v0 = vld [vmem:[%s2369_s7 + $0x78] sm:$0xff] }
 0x19b   :  { %1301 = vmatprep.subr.mxu0 %v554_v2  ;;  %777 = vmatpush1.msra.mxu1 %v570_v3  ;;  %v389_v2 = vld [vmem:[%s2367_s5 + $0x70] sm:$0xff] }
 0x19c   :  { %1302 = vmatpush3.msra.mxu0 %v506_v5  ;;  %778 = vmatprep.subr.mxu1 %v568_v6  ;;  %v1062_v3 = vld [vmem:[%s2369_s7 + $0xf0] sm:$0xff]  ;;  %v434_v5 = vld [vmem:[%s2367_s5 + $0x1d8] sm:$0xff] }
 0x19d   :  { %1303 = vmatprep.subr.mxu0 %v551_v7  ;;  %779 = vmatpush1.msra.mxu1 %v567_v8  ;;  %v1046_v6 = vld [vmem:[%s2369_s7 + $0x70] sm:$0xff]  ;;  %v431_v7 = vld [vmem:[%s2367_s5 + $0x1c0] sm:$0xff]  ;;  %v1045_v8 = vld [vmem:[%s2369_s7 + $0x68] sm:$0xff] }
 0x19e   :  { %812 = vmatprep.mubr.f32.mxu1 %v1441_v1  ;;  %1304 = vmatpush3.msra.mxu0 %v503_v9  ;;  %v383_v9 = vld [vmem:[%s2367_s5 + $0x40] sm:$0xff] }
 0x19f   :  { %1248 = vmatmul.mubr.msk.f32.vlgmr.msra.gmra.mxu1 %vm602_vm2, %v374_v11  ;;  %1258 = vmatprep.subr.mxu1 %v470_v10  ;;  %v1060_v10 = vld [vmem:[%s2369_s7 + $0xe0] sm:$0xff] }
 0x1a0   :  { %1305 = vmatprep.subr.mxu0 %v548_v12  ;;  %1259 = vmatpush3.msra.mxu1 %v422_v13  ;;  %v428_v12 = vld [vmem:[%s2367_s5 + $0x1a8] sm:$0xff]  ;;  %v1044_v13 = vld [vmem:[%s2369_s7 + $0x60] sm:$0xff] }
 0x1a1   :  { %883 = vmatprep.mubr.f32.mxu1 %v371_v43  ;;  %1306 = vmatpush3.msra.mxu0 %v500_v14  ;;  %v530_v43 = vld [vmem:[%s2367_s5 + $0x4d8] sm:$0xff]  ;;  %v380_v14 = vld [vmem:[%s2367_s5 + $0x28] sm:$0xff] }
 0x1a2   :  { %1260 = vmatprep.subr.mxu1 %v467_v15  ;;  %1307 = vmatprep.subr.mxu0 %v545_v16  ;;  %v1059_v15 = vld [vmem:[%s2369_s7 + $0xd8] sm:$0xff]  ;;  %v425_v16 = vld [vmem:[%s2367_s5 + $0x190] sm:$0xff] }
 0x1a3   :  { %1261 = vmatpush3.msra.mxu1 %v419_v17  ;;  %1308 = vmatpush3.msra.mxu0 %v497_v18  ;;  %v1043_v17 = vld [vmem:[%s2369_s7 + $0x58] sm:$0xff]  ;;  %v377_v18 = vld [vmem:[%s2367_s5 + $0x10] sm:$0xff] }
 0x1a4   :  { %1262 = vmatprep.subr.mxu1 %v464_v19  ;;  %1309 = vmatprep.subr.mxu0 %v542_v20  ;;  %v1058_v19 = vld [vmem:[%s2369_s7 + $0xd0] sm:$0xff]  ;;  %v584_v20 = vld [vmem:[%s2367_s5 + $0x688] sm:$0xff] }
 0x1a5   :  { %1263 = vmatpush3.msra.mxu1 %v416_v21  ;;  %1310 = vmatpush3.msra.mxu0 %v494_v22  ;;  %v1042_v21 = vld [vmem:[%s2369_s7 + $0x50] sm:$0xff] }
 0x1a6   :  { %1264 = vmatprep.subr.mxu1 %v461_v27  ;;  %1311 = vmatprep.subr.mxu0 %v539_v29  ;;  %v581_v22 = vld [vmem:[%s2367_s5 + $0x670] sm:$0xff]  ;;  %v1057_v27 = vld [vmem:[%s2369_s7 + $0xc8] sm:$0xff] }
 0x1a7   :  { %1265 = vmatpush3.msra.mxu1 %v413_v30  ;;  %1312 = vmatpush3.msra.mxu0 %v491_v31  ;;  %v572_v29 = vld [vmem:[%s2367_s5 + $0x628] sm:$0xff]  ;;  %v569_v30 = vld [vmem:[%s2367_s5 + $0x610] sm:$0xff] }
 0x1a8   :  { %1266 = vmatprep.subr.mxu1 %v458_v32  ;;  %1313 = vmatprep.subr.mxu0 %v536_v33  ;;  %v1041_v31 = vld [vmem:[%s2369_s7 + $0x48] sm:$0xff]  ;;  %v1056_v32 = vld [vmem:[%s2369_s7 + $0xc0] sm:$0xff]  ;;  %v1039_v33 = vld [vmem:[%s2369_s7 + $0x38] sm:$0xff] }
 0x1a9   :  { %1267 = vmatpush3.msra.mxu1 %v410_v34  ;;  %1314 = vmatpush3.msra.mxu0 %v488_v35  ;;  %v1054_v34 = vld [vmem:[%s2369_s7 + $0xb0] sm:$0xff] }
 0x1aa   :  { %1268 = vmatprep.subr.mxu1 %v455_v38  ;;  %1315 = vmatprep.subr.mxu0 %v533_v39  ;;  %v1038_v35 = vld [vmem:[%s2369_s7 + $0x30] sm:$0xff]  ;;  %v1053_v38 = vld [vmem:[%s2369_s7 + $0xa8] sm:$0xff] }
 0x1ab   :  { %1269 = vmatpush3.msra.mxu1 %v407_v40  ;;  %1316 = vmatpush3.msra.mxu0 %v485_v41  ;;  %v1037_v39 = vld [vmem:[%s2369_s7 + $0x28] sm:$0xff]  ;;  %v1052_v40 = vld [vmem:[%s2369_s7 + $0xa0] sm:$0xff] }
 0x1ac   :  { %1270 = vmatprep.subr.mxu1 %v452_v42  ;;  %1317 = vmatprep.subr.mxu0 %v530_v43  ;;  %v1036_v41 = vld [vmem:[%s2369_s7 + $0x20] sm:$0xff]  ;;  %v1051_v42 = vld [vmem:[%s2369_s7 + $0x98] sm:$0xff] }
 0x1ad   :  { %1271 = vmatpush3.msra.mxu1 %v404_v44  ;;  %1318 = vmatpush3.msra.mxu0 %v482_v47  ;;  %v1035_v43 = vld [vmem:[%s2369_s7 + $0x18] sm:$0xff]  ;;  %v1050_v44 = vld [vmem:[%s2369_s7 + $0x90] sm:$0xff] }
 0x1ae   :  { %1272 = vmatprep.subr.mxu1 %v449_v48  ;;  %1319 = vmatprep.subr.mxu0 %v527_v49  ;;  %v1034_v47 = vld [vmem:[%s2369_s7 + $0x10] sm:$0xff]  ;;  %v1049_v48 = vld [vmem:[%s2369_s7 + $0x88] sm:$0xff] }
 0x1af   :  { %1273 = vmatpush3.msra.mxu1 %v401_v50  ;;  %1320 = vmatpush3.msra.mxu0 %v479_v51  ;;  %v1033_v49 = vld [vmem:[%s2369_s7 + $0x8] sm:$0xff]  ;;  %v1048_v50 = vld [vmem:[%s2369_s7 + $0x80] sm:$0xff] }
 0x1b0   :  { %1274 = vmatprep.subr.mxu1 %v446_v52  ;;  %1321 = vmatprep.subr.mxu0 %v524_v53  ;;  %v1032_v51 = vld [vmem:[%s2369_s7] sm:$0xff]  ;;  %v1066_v52 = vld [vmem:[%s2369_s7 + $0x110] sm:$0xff]  ;;  %v1065_v53 = vld [vmem:[%s2369_s7 + $0x108] sm:$0xff] }
 0x1b1   :  { %1275 = vmatpush3.msra.mxu1 %v398_v54  ;;  %1322 = vmatpush3.msra.mxu0 %v476_v55  ;;  %v1064_v54 = vld [vmem:[%s2369_s7 + $0x100] sm:$0xff] }
 0x1b2   :  { %1276 = vmatprep.subr.mxu1 %v443_v56  ;;  %1323 = vmatprep.subr.mxu0 %v521_v57  ;;  %v585_v55 = vld [vmem:[%s2368_s6] sm:$0x7] }
 0x1b3   :  { %1277 = vmatpush3.msra.mxu1 %v395_v58  ;;  %1324 = vmatpush3.msra.mxu0 %v473_v59  ;;  %v590_v57 = vrot.slane %v585_v55, %v132_v25  ;;  %v594_v58 = vrot.slane %v585_v55, %v136_v28  ;;  %v598_v28 = vrot.slane %v585_v55, %v140_v26 }
 0x1b4   :  { %1278 = vmatprep.subr.mxu1 %v440_v60  ;;  %954 = vmatmul.mubr.f32.vlgmr.msra.gmra.mxu0 %v372_v46  ;;  %v1061_v46 = vld [vmem:[%s2369_s7 + $0xe8] sm:$0xff] }
 0x1b5   :  { %1279 = vmatpush3.msra.mxu1 %v392_v61  ;;  %1335 = vmatprep.subr.mxu0 %v1063_v62 }
 0x1b6   :  { %1280 = vmatprep.subr.mxu1 %v437_v63  ;;  %1336 = vmatpush3.msra.mxu0 %v1047_v0 }
 0x1b7   :  { %1281 = vmatpush3.msra.mxu1 %v389_v2  ;;  %1337 = vmatprep.subr.mxu0 %v1062_v3 }
 0x1b8   :  { %1282 = vmatprep.subr.mxu1 %v434_v5  ;;  %1338 = vmatpush3.msra.mxu0 %v1046_v6 }
 0x1b9   :  { %1283 = vmatpush3.msra.mxu1 %v386_v37  ;;  %1339 = vmatprep.subr.mxu0 %v1061_v46 }
 0x1ba   :  { %1284 = vmatprep.subr.mxu1 %v431_v7  ;;  %1340 = vmatpush3.msra.mxu0 %v1045_v8 }
 0x1bb   :  { %1285 = vmatpush3.msra.mxu1 %v383_v9  ;;  %1341 = vmatprep.subr.mxu0 %v1060_v10 }
 0x1bc   :  { %1286 = vmatprep.subr.mxu1 %v428_v12  ;;  %1342 = vmatpush3.msra.mxu0 %v1044_v13 }
 0x1bd   :  { %1287 = vmatpush3.msra.mxu1 %v380_v14  ;;  %1343 = vmatprep.subr.mxu0 %v1059_v15 }
 0x1be   :  { %1288 = vmatprep.subr.mxu1 %v425_v16  ;;  %1344 = vmatpush3.msra.mxu0 %v1043_v17 }
 0x1bf   :  { %1289 = vmatpush3.msra.mxu1 %v377_v18  ;;  %1345 = vmatprep.subr.mxu0 %v1058_v19 }
 0x1c0   :  { %884 = vmatmul.mubr.f32.vlgmr.msra.gmra.mxu1 %v370_v45  ;;  %1388 = vmatprep.subr.mxu1 %v1441_v1  ;;  %v575_v45 = vld [vmem:[%s2367_s5 + $0x640] sm:$0xff] }
 0x1c1   :  { %1389 = vmatpush3.msra.mxu1 %v584_v20  ;;  %1400 = vmatprep.mubr.msk.f32.mxu1 %vm1442_vm0, %v1441_v1 }
 0x1c2   :  { %1390 = vmatprep.subr.mxu1 %v1441_v1  ;;  %1346 = vmatpush3.msra.mxu0 %v1042_v21 }
 0x1c3   :  { %1391 = vmatpush3.msra.mxu1 %v581_v22  ;;  %1347 = vmatprep.subr.mxu0 %v1057_v27  ;;  %v1250_v22 = vld [vmem:[%s2370_s8] ss:$0 sm:$0xff]  ;;  %s1419_s8 = scalar_lea.vmem %s1236_s20, 128 }
 0x1c4   :  { %1392 = vmatprep.subr.mxu1 %v1441_v1  ;;  %1348 = vmatpush3.msra.mxu0 %v1041_v31  ;;  %p1420_p0 = scmp.ne.s32.totalorder %s1236_s20, %s1419_s8  ;;  %p1425_p2 = scmp.lt.s32.totalorder %s1419_s8, %s1419_s8 }
 0x1c5   :  { %1393 = vmatpush3.msra.mxu1 %v578_v36  ;;  %1349 = vmatprep.subr.mxu0 %v1056_v32  ;;  %v1224_v32 = vand.u32 127, %v130_v23 }
 0x1c6   :  { %1394 = vmatprep.subr.mxu1 %v1441_v1  ;;  %1350 = vmatpush3.msra.mxu0 %v1040_v4  ;;  %p1426_p3 = por %p1425_p2, %p1424_p1 }
 0x1c7   :  { %1395 = vmatpush3.msra.mxu1 %v575_v45  ;;  %vm1225_vm4 = vcmp.ge.s32.totalorder %v1224_v32, 20 }
 0x1c8   :  { %1396 = vmatprep.subr.mxu1 %v1441_v1  ;;  %p1427_p4 = pnand %p1426_p3, %p1420_p0 }
 0x1c9   :  { %1397 = vmatpush3.msra.mxu1 %v572_v29 }
 0x1ca   :  { %1398 = vmatprep.subr.mxu1 %v1441_v1 }
 0x1cb   :  { %1399 = vmatpush3.msra.mxu1 %v569_v30 }
 0x1cc   :  { %1401 = vmatmul.mubr.msk.f32.vlgmr.msra.gmra.mxu1 %vm602_vm2, %v374_v11  ;;  %1403 = vmatprep.subr.mxu1 %v1441_v1  ;;  %v1055_v11 = vld [vmem:[%s2369_s7 + $0xb8] sm:$0xff] }
 0x1cd   :  { %1409 = vmatprep.mubr.msk.f32.mxu1 %vm1442_vm0, %v1441_v1  ;;  %1351 = vmatprep.subr.mxu0 %v1055_v11 }
 0x1ce   :  { %1352 = vmatpush3.msra.mxu0 %v1039_v33  ;;  %1404 = vmatpush3.msra.mxu1 %v1066_v52 }
 0x1cf   :  { %1353 = vmatprep.subr.mxu0 %v1054_v34  ;;  %1405 = vmatprep.subr.mxu1 %v1441_v1 }
 0x1d0   :  { %1354 = vmatpush3.msra.mxu0 %v1038_v35  ;;  %1406 = vmatpush3.msra.mxu1 %v1065_v53 }
 0x1d1   :  { %1355 = vmatprep.subr.mxu0 %v1053_v38  ;;  %1407 = vmatprep.subr.mxu1 %v1441_v1 }
 0x1d2   :  { %1356 = vmatpush3.msra.mxu0 %v1037_v39  ;;  %1408 = vmatpush3.msra.mxu1 %v1064_v54 }
 0x1d3   :  { %1357 = vmatprep.subr.mxu0 %v1052_v40 }
 0x1d4   :  { %1358 = vmatpush3.msra.mxu0 %v1036_v41 }
 0x1d5   :  { %1359 = vmatprep.subr.mxu0 %v1051_v42 }
 0x1d6   :  { %1360 = vmatpush3.msra.mxu0 %v1035_v43 }
 0x1d7   :  { %1361 = vmatprep.subr.mxu0 %v1050_v44 }
 0x1d8   :  { %1362 = vmatpush3.msra.mxu0 %v1034_v47 }
 0x1d9   :  { %1363 = vmatprep.subr.mxu0 %v1049_v48 }
 0x1da   :  { %1364 = vmatpush3.msra.mxu0 %v1033_v49 }
 0x1db   :  { %1365 = vmatprep.subr.mxu0 %v1048_v50 }
 0x1dc   :  { %1366 = vmatpush3.msra.mxu0 %v1032_v51 }
 0x252   :  { %v672_v56 = vpop.f32.mrf.mxu0  ;;  %v743_v59 = vpop.f32.mrf.mxu1 }
 0x253   :  { %v673_v61 = vadd.f32 %v672_v56, %v590_v57 }
 0x254   :  { %v674_v60 = vpop.f32.mrf.mxu0  ;;  %v745_v62 = vpop.f32.mrf.mxu1 }
 0x255   :  { %v675_v1 = vadd.f32 %v674_v60, %v594_v58  ;;  %v744_v63 = vadd.f32 %v743_v59, %v673_v61 }
 0x257   :  { %v746_v2 = vadd.f32 %v745_v62, %v675_v1 }
 0x25f   :  { %v814_v0 = vpop.f32.mrf.mxu1 }
 0x260   :  { %v815_v3 = vadd.f32 %v814_v0, %v744_v63 }
 0x261   :  { %v816_v5 = vpop.f32.mrf.mxu1 }
 0x262   :  { %v817_v6 = vadd.f32 %v816_v5, %v746_v2  ;;  %v1029_v46 = vmax.f32 %v815_v3, 0.0 }
 0x264   :  { %v1030_v37 = vmax.f32 %v817_v6, 0.0 }
 0x266   :  { %1142 = vmatprep.mubr.f32.mxu0 %v1030_v37 }
 0x267   :  { %1143 = vmatmul.mubr.f32.vlgmr.msra.gmra.mxu0 %v1029_v46 }
 0x274   :  { %v1325_v25 = vpop.f32.mrf.mxu0 }
 0x276   :  { %v1326_v10 = vpop.f32.mrf.mxu0 }
 0x277   :  { %v1327_v13 = vadd.f32 %v1326_v10, %v1325_v25 }
 0x280   :  { %v1290_v7 = vpop.f32.mrf.mxu1 }
 0x282   :  { %v1291_v8 = vpop.f32.mrf.mxu1 }
 0x283   :  { %v1292_v9 = vadd.f32 %v1291_v8, %v1290_v7 }
 0x285   :  { %v886_v12 = vadd.f32 %v1292_v9, %v598_v28 }
 0x287   :  { %v956_v14 = vadd.f32 %v1327_v13, %v886_v12 }
 0x28c   :  { %v1025_v15 = vpop.f32.mrf.mxu1 }
 0x28d   :  { %v1026_v16 = vadd.f32 %v1025_v15, %v956_v14 }
 0x28e   :  { %v1402_v17 = vpop.f32.mrf.mxu1 }
 0x28f   :  { %v1031_v18 = vmax.f32 %v1026_v16, 0.0 }
 0x291   :  { %1410 = vmatmul.mubr.msk.f32.vlgmr.msra.gmra.mxu1 %vm1074_vm3, %v1031_v18 }
 0x327   :  { %v1367_v19 = vpop.f32.mrf.mxu0 }
 0x329   :  { %v1368_v20 = vpop.f32.mrf.mxu0 }
 0x32a   :  { %v1369_v21 = vadd.f32 %v1368_v20, %v1367_v19 }
 0x32c   :  { %v1145_v24 = vadd.f32 %v1369_v21, %v1250_v22 }
 0x351   :  { %v1214_v26 = vpop.f32.mrf.mxu1 }
 0x352   :  { %v1215_v27 = vadd.f32 %v1214_v26, %v1145_v24 }
 0x353   :  { %v1411_v36 = vpop.f32.mrf.mxu1 }
 0x354   :  { %v1218_v45 = vsub.f32 0.0, %v1215_v27 }
 0x356   :  { %v1219_v29 = vmul.f32 1.442695, %v1218_v45 }
 0x358   :  { %1415 = vpow2.f32 %v1219_v29 }
 0x365   :  { %v1416_v30 = vpop.eup %1415 }
 0x366   :  { %v1221_v31 = vadd.f32 1.0, %v1416_v30 }
 0x368   :  { %1417 = vrcp.f32 %v1221_v31 }
 0x375   :  { %v1418_v4 = vpop.eup %1417 }
 0x376   :  { %v1226_v11 = vsel %vm1225_vm4, %v1418_v4, %v1215_v27 }
 0x377   :  { %1228 = vst.msk [vmem:[#allocation2] sm:$0xff] %vm1227_vm5, %v1226_v11 }
 0x378   :  { %1430 = shalt.err (!%p1427_p4)
}
 0x379   :  { %1238 = dma.vmem_to_hbm [thread:$0]  %s1236_s20, 128, %s2371_s9, [#allocation3]  }
 0x37a   :  { %1439 = dma.done.wait [#allocation3], 128  }
 0x37b   :  { %1440 = vsyncadd [#allocation3], 4294967168 }
 0x37c   :  { %1242 = vsyncpa [#allocation3], 1 }

</bundles_post_ra>
